<compile_context>
chip_gen: v7x
topology: tpu7x:2x2x1
jax: 0.10.0
libtpu: 0.0.40
codegen_flags: <defaults>
</compile_context>

<pallas_src>
import jax
import jax.numpy as jnp
from jax.experimental import pallas as pl
from jax.experimental.pallas import tpu as pltpu


def _mlp_kernel(x_ref, w1_ref, b1_ref, w2_ref, b2_ref, w3c_ref, b3_ref, o_ref):
    # x_ref  : [TB, 2]  (natural PyTorch layout; batch on sublanes)
    # w1_ref : [30, 2]   b1_ref: [30, 1]
    # w2_ref : [20, 30]  b2_ref: [20, 1]
    # w3c_ref: [20, 1]   b3_ref: [1, 1]
    # o_ref  : [1, TB]  (lane-dense: batch on the 128-lane axis)

    # Single relayout to batch-on-lanes, on the otherwise idle XLU.
    x_t = x_ref[...].T                                                    # [2, TB]

    # Layer 1 (2 -> 30) as two broadcast FMAs on the VPU; a K=2 matmul would waste an
    # MXU pass and pay weight-push/drain latency every grid step.
    w1 = w1_ref[...]                                                      # [30, 2]
    h1 = w1[:, 0:1] * x_t[0:1, :] + w1[:, 1:2] * x_t[1:2, :] + b1_ref[...]
    h1 = jnp.maximum(h1, 0.0)                                             # [30, TB]

    # Layer 2 (30 -> 20): the only real matmul; keep it on the MXU.
    h2 = jnp.dot(w2_ref[...], h1, preferred_element_type=jnp.float32) + b2_ref[...]
    h2 = jnp.maximum(h2, 0.0)                                             # [20, TB]

    # Layer 3 (20 -> 1) on the VPU + a sublane reduction; avoids an M=1 MXU pass.
    y = jnp.sum(w3c_ref[...] * h2, axis=0, keepdims=True) + b3_ref[...]   # [1, TB]

    # Exact sigmoid via tanh (EUP slot); no f32 divide on the VALU.
    o_ref[...] = 0.5 * (jnp.tanh(0.5 * y) + 1.0)


def _pick_tile_b(batch):
    # Large tiles amortize the ~0.35 us per-step pipeline overhead; cap keeps the
    # lane-padded [tile_b, 2] input block + f32 intermediates well inside the default
    # scoped-VMEM budget on v5e/v6e/v7x.  Keep >= 2 grid steps when the batch allows it
    # so the "parallel" grid axis can split across v7x's two TensorCores.
    cap = 4096
    half = -(-batch // 2)            # ceil(batch / 2)
    half = -(-half // 128) * 128     # round up to a lane multiple
    return max(128, min(cap, half))


def network_model_moons(x, params, *, tile_b=None):
    """x: [B, 2] float32 (natural PyTorch layout). params = ((w1,b1),(w2,b2),(w3,b3)) in
    PyTorch layout (w: [out, in], b: [out]). Returns [B, 1], matching the torch forward."""
    (w1, b1), (w2, b2), (w3, b3) = params
    B, F = x.shape
    assert F == 2
    assert w1.shape == (30, 2) and w2.shape == (20, 30) and w3.shape == (1, 20)

    if tile_b is None:
        tile_b = _pick_tile_b(B)
    assert tile_b % 128 == 0
    n_tiles = pl.cdiv(B, tile_b)     # ragged final block is masked by Pallas

    x = x.astype(jnp.float32)                       # no transpose / pad HBM pass
    w1 = w1.astype(jnp.float32)
    w2 = w2.astype(jnp.float32)
    b1c = b1.reshape(30, 1).astype(jnp.float32)
    b2c = b2.reshape(20, 1).astype(jnp.float32)
    w3c = w3.reshape(20, 1).astype(jnp.float32)     # column form (== w3.T), tiny
    b3c = b3.reshape(1, 1).astype(jnp.float32)

    param_bytes = 4 * (30 * 2 + 30 + 20 * 30 + 20 + 20 + 1)
    cost = pl.CostEstimate(
        flops=int(B * (2 * 2 * 30 + 2 * 30 * 20 + 2 * 20)),
        transcendentals=int(B),
        bytes_accessed=int(B * (2 + 1) * 4 + param_bytes),
    )

    out_row = pl.pallas_call(
        _mlp_kernel,
        out_shape=jax.ShapeDtypeStruct((1, B), jnp.float32),
        grid_spec=pl.GridSpec(
            grid=(n_tiles,),
            in_specs=[
                pl.BlockSpec((tile_b, 2), lambda i: (i, 0)),   # streamed activations
                pl.BlockSpec((30, 2), lambda i: (0, 0)),       # params: constant index_map
                pl.BlockSpec((30, 1), lambda i: (0, 0)),       #  -> resident in VMEM
                pl.BlockSpec((20, 30), lambda i: (0, 0)),
                pl.BlockSpec((20, 1), lambda i: (0, 0)),
                pl.BlockSpec((20, 1), lambda i: (0, 0)),
                pl.BlockSpec((1, 1), lambda i: (0, 0)),
            ],
            out_specs=pl.BlockSpec((1, tile_b), lambda i: (0, i)),   # lane-dense output
        ),
        compiler_params=pltpu.CompilerParams(
            dimension_semantics=("parallel",),
        ),
        cost_estimate=cost,
    )(x, w1, b1c, w2, b2c, w3c, b3c)

    # [1, B] -> [B, 1]: contiguous reshape, no data movement.
    return out_row.reshape(B, 1)


if __name__ == "__main__":
    key = jax.random.PRNGKey(0)
    k_x, k_w1, k_b1, k_w2, k_b2, k_w3, k_b3 = jax.random.split(key, 7)

    # Deterministic init mirroring nn.Linear default:
    # uniform(-1/sqrt(in_features), 1/sqrt(in_features)) for both weight and bias.
    def linear_init(kw, kb, out_f, in_f):
        bound = 1.0 / jnp.sqrt(float(in_f))
        w = jax.random.uniform(kw, (out_f, in_f), jnp.float32, -bound, bound)
        b = jax.random.uniform(kb, (out_f,), jnp.float32, -bound, bound)
        return w, b

    w1, b1 = linear_init(k_w1, k_b1, 30, 2)
    w2, b2 = linear_init(k_w2, k_b2, 20, 30)
    w3, b3 = linear_init(k_w3, k_b3, 1, 20)
    params = ((w1, b1), (w2, b2), (w3, b3))

    # Moons-sized batch; 200 = 128 + 72 also exercises the ragged final grid block.
    batch = 200
    x = jax.random.normal(k_x, (batch, 2), dtype=jnp.float32)

    out = network_model_moons(x, params)
    out = jax.block_until_ready(out)

    # Pure-JAX reference of the PyTorch forward.
    h1 = jax.nn.relu(x @ w1.T + b1)
    h2 = jax.nn.relu(h1 @ w2.T + b2)
    ref = jax.nn.sigmoid(h2 @ w3.T + b3)

    assert out.shape == (batch, 1)
    assert jnp.allclose(out, ref, atol=1e-5, rtol=1e-5)
    print("KERNEL_OK")
</pallas_src>

<mosaic_0001>
module attributes {stable_mosaic.version = 11 : i64} {
  func.func @_mlp_kernel(%arg0: i32, %arg1: memref<128x2xf32, #tpu.memory_space<vmem>>, %arg2: memref<30x2xf32, #tpu.memory_space<vmem>>, %arg3: memref<30x1xf32, #tpu.memory_space<vmem>>, %arg4: memref<20x30xf32, #tpu.memory_space<vmem>>, %arg5: memref<20x1xf32, #tpu.memory_space<vmem>>, %arg6: memref<20x1xf32, #tpu.memory_space<vmem>>, %arg7: memref<1x1xf32, #tpu.memory_space<vmem>>, %arg8: memref<1x128xf32, #tpu.memory_space<vmem>>) attributes {dimension_semantics = [#tpu.dimension_semantics<parallel>], iteration_bounds = array<i64: 2>, scalar_prefetch = 0 : i64, scratch_operands = 0 : i64, tpu.core_type = #tpu.core_type<tc>, window_params = [{transform_indices = @transform_0, window_bounds = array<i64: 128, 2>}, {pipeline_mode = #tpu.pipeline_mode<synchronous>, transform_indices = @transform_1, window_bounds = array<i64: 30, 2>}, {pipeline_mode = #tpu.pipeline_mode<synchronous>, transform_indices = @transform_2, window_bounds = array<i64: 30, 1>}, {pipeline_mode = #tpu.pipeline_mode<synchronous>, transform_indices = @transform_3, window_bounds = array<i64: 20, 30>}, {pipeline_mode = #tpu.pipeline_mode<synchronous>, transform_indices = @transform_4, window_bounds = array<i64: 20, 1>}, {pipeline_mode = #tpu.pipeline_mode<synchronous>, transform_indices = @transform_5, window_bounds = array<i64: 20, 1>}, {pipeline_mode = #tpu.pipeline_mode<synchronous>, transform_indices = @transform_6, window_bounds = array<i64: 1, 1>}, {transform_indices = @transform_7, window_bounds = array<i64: 1, 128>}]} {
    %c0 = arith.constant 0 : index
    %c0_0 = arith.constant 0 : index
    %0 = vector.load %arg1[%c0, %c0_0] : memref<128x2xf32, #tpu.memory_space<vmem>>, vector<128x2xf32>
    %1 = tpu.transpose %0, [1, 0] : vector<128x2xf32> -> vector<2x128xf32>
    %c0_1 = arith.constant 0 : index
    %c0_2 = arith.constant 0 : index
    %2 = vector.load %arg2[%c0_1, %c0_2] : memref<30x2xf32, #tpu.memory_space<vmem>>, vector<30x2xf32>
    %3 = vector.extract_strided_slice %2 {offsets = [0, 0], sizes = [30, 1], strides = [1, 1]} : vector<30x2xf32> to vector<30x1xf32>
    %4 = vector.extract_strided_slice %1 {offsets = [0, 0], sizes = [1, 128], strides = [1, 1]} : vector<2x128xf32> to vector<1x128xf32>
    %5 = vector.broadcast %3 : vector<30x1xf32> to vector<30x128xf32>
    %6 = vector.broadcast %4 : vector<1x128xf32> to vector<30x128xf32>
    %7 = arith.mulf %5, %6 : vector<30x128xf32>
    %8 = vector.extract_strided_slice %2 {offsets = [0, 1], sizes = [30, 1], strides = [1, 1]} : vector<30x2xf32> to vector<30x1xf32>
    %9 = vector.extract_strided_slice %1 {offsets = [1, 0], sizes = [1, 128], strides = [1, 1]} : vector<2x128xf32> to vector<1x128xf32>
    %10 = vector.broadcast %8 : vector<30x1xf32> to vector<30x128xf32>
    %11 = vector.broadcast %9 : vector<1x128xf32> to vector<30x128xf32>
    %12 = arith.mulf %10, %11 : vector<30x128xf32>
    %13 = arith.addf %7, %12 : vector<30x128xf32>
    %c0_3 = arith.constant 0 : index
    %c0_4 = arith.constant 0 : index
    %14 = vector.load %arg3[%c0_3, %c0_4] : memref<30x1xf32, #tpu.memory_space<vmem>>, vector<30x1xf32>
    %15 = vector.broadcast %14 : vector<30x1xf32> to vector<30x128xf32>
    %16 = arith.addf %13, %15 : vector<30x128xf32>
    %cst = arith.constant 0.000000e+00 : f32
    %17 = vector.broadcast %cst : f32 to vector<30x128xf32>
    %18 = arith.maximumf %16, %17 : vector<30x128xf32>
    %c0_5 = arith.constant 0 : index
    %c0_6 = arith.constant 0 : index
    %19 = vector.load %arg4[%c0_5, %c0_6] : memref<20x30xf32, #tpu.memory_space<vmem>>, vector<20x30xf32>
    %cst_7 = arith.constant dense<0.000000e+00> : vector<20x128xf32>
    %20 = tpu.matmul %19, %18, %cst_7 {dimension_numbers = #tpu.dot_dimension_numbers<[1], [0], [0], [1], [0, 0, 1, 1], [], []>} : vector<20x30xf32>, vector<30x128xf32>, vector<20x128xf32> -> vector<20x128xf32>
    %c0_8 = arith.constant 0 : index
    %c0_9 = arith.constant 0 : index
    %21 = vector.load %arg5[%c0_8, %c0_9] : memref<20x1xf32, #tpu.memory_space<vmem>>, vector<20x1xf32>
    %22 = vector.broadcast %21 : vector<20x1xf32> to vector<20x128xf32>
    %23 = arith.addf %20, %22 : vector<20x128xf32>
    %cst_10 = arith.constant 0.000000e+00 : f32
    %24 = vector.broadcast %cst_10 : f32 to vector<20x128xf32>
    %25 = arith.maximumf %23, %24 : vector<20x128xf32>
    %c0_11 = arith.constant 0 : index
    %c0_12 = arith.constant 0 : index
    %26 = vector.load %arg6[%c0_11, %c0_12] : memref<20x1xf32, #tpu.memory_space<vmem>>, vector<20x1xf32>
    %27 = vector.broadcast %26 : vector<20x1xf32> to vector<20x128xf32>
    %28 = arith.mulf %27, %25 : vector<20x128xf32>
    %cst_13 = arith.constant dense<0.000000e+00> : vector<128xf32>
    %29 = vector.multi_reduction <add>, %28, %cst_13 [0] : vector<20x128xf32> to vector<128xf32>
    %30 = vector.shape_cast %29 : vector<128xf32> to vector<1x128xf32>
    %c0_14 = arith.constant 0 : index
    %c0_15 = arith.constant 0 : index
    %31 = vector.load %arg7[%c0_14, %c0_15] : memref<1x1xf32, #tpu.memory_space<vmem>>, vector<1x1xf32>
    %32 = vector.broadcast %31 : vector<1x1xf32> to vector<1x128xf32>
    %33 = arith.addf %30, %32 : vector<1x128xf32>
    %cst_16 = arith.constant 5.000000e-01 : f32
    %34 = vector.broadcast %cst_16 : f32 to vector<1x128xf32>
    %35 = arith.mulf %34, %33 : vector<1x128xf32>
    %36 = math.tanh %35 : vector<1x128xf32>
    %cst_17 = arith.constant 1.000000e+00 : f32
    %37 = vector.broadcast %cst_17 : f32 to vector<1x128xf32>
    %38 = arith.addf %36, %37 : vector<1x128xf32>
    %cst_18 = arith.constant 5.000000e-01 : f32
    %39 = vector.broadcast %cst_18 : f32 to vector<1x128xf32>
    %40 = arith.mulf %39, %38 : vector<1x128xf32>
    %c0_19 = arith.constant 0 : index
    %c0_20 = arith.constant 0 : index
    %41 = vector.load %arg8[%c0_19, %c0_20] : memref<1x128xf32, #tpu.memory_space<vmem>>, vector<1x128xf32>
    tpu.vector_store %arg8[%c0_19, %c0_20], %40 {strides = array<i32>} : memref<1x128xf32, #tpu.memory_space<vmem>>, vector<1x128xf32>,
    return
  }
  func.func @transform_0(%arg0: i32) -> (i32, i32) {
    %c0_i32 = arith.constant 0 : i32
    %c0_i32_0 = arith.constant 0 : i32
    return %arg0, %c0_i32 : i32, i32
  }
  func.func @transform_1(%arg0: i32) -> (i32, i32) {
    %c0_i32 = arith.constant 0 : i32
    %c0_i32_0 = arith.constant 0 : i32
    %c0_i32_1 = arith.constant 0 : i32
    return %c0_i32, %c0_i32_0 : i32, i32
  }
  func.func @transform_2(%arg0: i32) -> (i32, i32) {
    %c0_i32 = arith.constant 0 : i32
    %c0_i32_0 = arith.constant 0 : i32
    %c0_i32_1 = arith.constant 0 : i32
    return %c0_i32, %c0_i32_0 : i32, i32
  }
  func.func @transform_3(%arg0: i32) -> (i32, i32) {
    %c0_i32 = arith.constant 0 : i32
    %c0_i32_0 = arith.constant 0 : i32
    %c0_i32_1 = arith.constant 0 : i32
    return %c0_i32, %c0_i32_0 : i32, i32
  }
  func.func @transform_4(%arg0: i32) -> (i32, i32) {
    %c0_i32 = arith.constant 0 : i32
    %c0_i32_0 = arith.constant 0 : i32
    %c0_i32_1 = arith.constant 0 : i32
    return %c0_i32, %c0_i32_0 : i32, i32
  }
  func.func @transform_5(%arg0: i32) -> (i32, i32) {
    %c0_i32 = arith.constant 0 : i32
    %c0_i32_0 = arith.constant 0 : i32
    %c0_i32_1 = arith.constant 0 : i32
    return %c0_i32, %c0_i32_0 : i32, i32
  }
  func.func @transform_6(%arg0: i32) -> (i32, i32) {
    %c0_i32 = arith.constant 0 : i32
    %c0_i32_0 = arith.constant 0 : i32
    %c0_i32_1 = arith.constant 0 : i32
    return %c0_i32, %c0_i32_0 : i32, i32
  }
  func.func @transform_7(%arg0: i32) -> (i32, i32) {
    %c0_i32 = arith.constant 0 : i32
    %c0_i32_0 = arith.constant 0 : i32
    return %c0_i32, %arg0 : i32, i32
  }
}

</mosaic_0001>

<bundles_post_ra>
// kernel: tpu_custom_call.1
= control target key start
LH: loop header
LB: loop body
LE: loop exit
PB: predicated region body
PF: predicated region fallthrough
CT: control target
= control target key end

     0   :  { %s1078_s0 = inlined_call_operand.vmem [shape: f32[200,2], index: 0, kind: input, shape index: {}]   ;;  %s1079_s1 = inlined_call_operand.vmem [shape: f32[30,2], index: 1, kind: input, shape index: {}]   ;;  %s1080_s2 = inlined_call_operand.vmem [shape: f32[30,1], index: 2, kind: input, shape index: {}]   ;;  %s1081_s3 = inlined_call_operand.vmem [shape: f32[20,30], index: 3, kind: input, shape index: {}]   ;;  %s1082_s4 = inlined_call_operand.vmem [shape: f32[20,1], index: 4, kind: input, shape index: {}]   ;;  %s1083_s5 = inlined_call_operand.vmem [shape: f32[20,1], index: 5, kind: input, shape index: {}]   ;;  %s1084_s6 = inlined_call_operand.<no memory space> [shape: f32[1,1], index: 6, kind: input, shape index: {}]   ;;  %s1085_s7 = inlined_call_operand.hbm [shape: f32[1,200], index: 7, kind: output, shape index: {}]  }
   0x1   :  { %v12_v0 = vstv %s1084_s6 }
   0x2   :  { %13 = vst [vmem:[#allocation2] sm:$0x1] %v12_v0 }
   0x3   :  { %14 = vsyncpa [#allocation4], 0 }
   0x4   :  { %16 = vsyncpa [#allocation4 + $0x1], 0  ;;  %s888_s26 = smov 0   ;;  %s890_s27 = smov 0  }
   0x5   :  { %s892_s28 = smov 0   ;;  %s894_s29 = smov 0  }
   0x6 LB: > { %s672_s6 = sadd.s32 4294967295, %s836_s29   ;;  %s673_s30 = sadd.s32 4294967294, %s836_s29   ;;  %s836_s29 = sphi %s894_s29, %s1091_s29   ;;  %s832_s28 = sphi %s892_s28, %s1090_s28   ;;  %s828_s27 = sphi %s890_s27, %s1089_s27   ;;  %s824_s26 = sphi %s888_s26, %s1088_s26  }
   0x7   : > { %s911_s8 = sadd.s32 1, %s836_s29   ;;  %s181_s9 = sadd.s32 1, %s832_s28 }
   0x8   : > { %s178_s10 = ssub.s32 %s836_s29, %s911_s8  ;;  %p191_p0 = scmp.ne.s32.totalorder %s832_s28, %s828_s27 }
   0x9   : > { %p179_p1 = scmp.eq.s32.totalorder %s178_s10, 0  ;;  %p192_p2 = scmp.eq.s32.totalorder %s672_s6, 1 }
   0xa   : > { %p197_p3 = scmp.ne.s32.totalorder %s828_s27, %s824_s26  ;;  %p198_p4 = scmp.eq.s32.totalorder %s673_s30, 1 }
   0xb   : > { %s923_s11 = scalar_select %p179_p1, %s832_s28, %s181_s9  }
   0xc   : > { %p925_p5 = por %p192_p2, %p191_p0  ;;  %p929_p6 = por %p198_p4, %p197_p3 }
   0xd   : > { %p676_p7 = scmp.ge.s32.totalorder %s836_s29, 1  ;;  %p251_p8 = scmp.lt.s32.totalorder %s836_s29, 3 }
   0xf   : > { %p252_p9 = pnand %p676_p7, %p251_p8 }
  0x10   : > { %v350_v1 = vld [vmem:[%s1079_s1 + $0x10] sm:$0xff] (!%p252_p9)  ;;  %v348_v2 = vld [vmem:[%s1079_s1] sm:$0xff] (!%p252_p9)  ;;  %v838_v3 = vmov (!%p252_p9), 1   ;;  %v349_v4 = vld [vmem:[%s1079_s1 + $0x8] sm:$0xff] (!%p252_p9)  ;;  %v839_v5 = vmov (!%p252_p9), 0   ;;  %s961_s15 = sshll.u32 (!%p252_p9), %s672_s6, 4  ;;  %v372_v43 = vlaneseq (!%p252_p9) }
  0x11   : > { %255 = sbr.rel (%p252_p9) target bundleno = 484 (0x1e4), region = 48  ;;  %768 = vset.pattern.permute.xlu0 (!%p252_p9), %v838_v3  ;;  %766 = vset.pattern.permute.xlu1 (!%p252_p9), %v838_v3  ;;  %v351_v6 = vld [vmem:[%s1079_s1 + $0x18] sm:$0x3f] (!%p252_p9)  ;;  %v409_v7 = vld [vmem:[%s1080_s2 + $0x8] sm:$0xff] (!%p252_p9)  ;;  %v408_v8 = vld [vmem:[%s1080_s2] sm:$0xff] (!%p252_p9)  ;;  %p291_p10 = scmp.lt.s32.totalorder (!%p252_p9), %s961_s15, 24 }
  0x12   : > { %389 = vperm.xlu0 (!%p252_p9), %768, %v350_v1   ;;  %381 = vperm.xlu1 (!%p252_p9), %766, %v348_v2   ;;  %v410_v9 = vld [vmem:[%s1080_s2 + $0x10] sm:$0xff] (!%p252_p9)  ;;  %v411_v10 = vld [vmem:[%s1080_s2 + $0x18] sm:$0x3f] (!%p252_p9)  ;;  %v443_v11 = vld [vmem:[%s1082_s4] sm:$0xff] (!%p252_p9)  ;;  %v840_v22 = vmov (!%p252_p9), 0.0|0.0   ;;  %vm841_vm0 = vmmov (!%p252_p9), 0   ;;  %s1036_s10 = scalar_lea.hbm (!%p252_p9), %s1085_s7, %s961_s15 }
  0x13   : > { %v444_v12 = vld [vmem:[%s1082_s4 + $0x8] sm:$0xff] (!%p252_p9)  ;;  %v445_v13 = vld [vmem:[%s1082_s4 + $0x10] sm:$0xf] (!%p252_p9)  ;;  %v558_v14 = vld [vmem:[%s1083_s5] sm:$0xff] (!%p252_p9)  ;;  %710 = vmatprep.subr.bf16.mxu0 (!%p252_p9), %v840_v22  ;;  %717 = vmatprep.subr.bf16.mxu1 (!%p252_p9), %v840_v22  ;;  %v842_v25 = vmov (!%p252_p9), 0.0   ;;  %v1010_v45 = vshrl.u32 (!%p252_p9), %v372_v43, 7 }
  0x14   : > { %v559_v15 = vld [vmem:[%s1083_s5 + $0x8] sm:$0xff] (!%p252_p9)  ;;  %v560_v17 = vld [vmem:[%s1083_s5 + $0x10] sm:$0xf] (!%p252_p9)  ;;  %v589_v19 = vld [vmem:[#allocation2] sm:$0x1] (!%p252_p9)  ;;  %701 = vmatprep.mubr.msk.f32.mxu0 (!%p252_p9), %vm841_vm0, %v842_v25  ;;  %704 = vmatprep.mubr.msk.f32.mxu1 (!%p252_p9), %vm841_vm0, %v842_v25  ;;  %vm471_vm1 = vcmask (!%p252_p9), 1045504  }
  0x15   : > { %v374_v48 = vsub.s32 (!%p252_p9), 0, %v1010_v45  ;;  %v398_v49 = vsub.s32 (!%p252_p9), 1, %v1010_v45  ;;  %vm843_vm2 = vmmov (!%p252_p9), 1   ;;  %vm461_vm4 = vcmask (!%p252_p9), 244736   ;;  %s284_s23 = sand.u32 (!%p252_p9), 1, %s828_s27   ;;  %s844_s17 = smov (!%p252_p9), [#allocation3]  }
  0x16   : > { %769 = vset.pattern.permute.xlu0 (!%p252_p9), %v839_v5  ;;  %385 = vperm.xlu1 (!%p252_p9), %766, %v349_v4   ;;  %vm715_vm3 = vmpackc.low (!%p252_p9), %vm471_vm1, %vm843_vm2  ;;  %vm580_vm5 = vcmask (!%p252_p9), 1043456   ;;  %s285_s24 = scalar_lea.vmem (!%p252_p9), [#allocation3], %s284_s23  ;;  %s606_s14 = scalar_lea.sflag (!%p252_p9), [#allocation4], %s284_s23 }
  0x17   : > { %354 = vperm.xlu0 (!%p252_p9), %769, %v348_v2   ;;  %s618_s25 = sshll.u32 (!%p252_p9), %s285_s24, 4  ;;  %s778_s18 = sshll.u32 (!%p252_p9), %s844_s17, 4  ;;  %s1038_s25 = int_to_ptr.vmem [resolvable:$true] %s618_s25  ;;  %s779_s18 = int_to_ptr.vmem [resolvable:$false] %s778_s18 }
  0x18   : > { %s292_s20 = scalar_select %p291_p10, %s961_s15, 24 }
  0x19   : > { %s774_s16 = scalar_lea.vmem %s1038_s25, 16  ;;  %s780_s19 = scalar_lea.vmem %s779_s18, 32 }
  0x1a   : > { %767 = vset.pattern.permute.xlu1 %v839_v5  ;;  %s678_s6 = sshll.u32 %s292_s20, 3  ;;  %p775_p11 = scmp.ne.s32.totalorder %s1038_s25, %s774_s16 }
  0x1b   : > { %359 = vperm.xlu0 %769, %v349_v4   ;;  %369 = vperm.xlu1 %767, %v351_v6   ;;  %s980_s9 = scalar_lea.vmem %s1078_s0, %s678_s6  ;;  %p781_p0 = scmp.lt.s32.totalorder %s1038_s25, %s779_s18 }
  0x1c   : > { %v300_v16 = vld [vmem:[%s980_s9] sm:$0xff]  ;;  %v301_v18 = vld [vmem:[%s980_s9 + $0x8] sm:$0xff]  ;;  %v302_v20 = vld [vmem:[%s980_s9 + $0x10] sm:$0xff]  ;;  %p776_p12 = pnand %p775_p11, %p925_p5  ;;  %p782_p1 = scmp.lt.s32.totalorder %s780_s19, %s774_s16 }
  0x1d   : > { %v303_v21 = vld [vmem:[%s980_s9 + $0x18] sm:$0xff]  ;;  %v304_v23 = vld [vmem:[%s980_s9 + $0x20] sm:$0xff]  ;;  %v305_v24 = vld [vmem:[%s980_s9 + $0x28] sm:$0xff] }
  0x1e   : > { %v306_v26 = vld [vmem:[%s980_s9 + $0x30] sm:$0xff]  ;;  %v307_v27 = vld [vmem:[%s980_s9 + $0x38] sm:$0xff]  ;;  %v308_v28 = vld [vmem:[%s980_s9 + $0x40] sm:$0xff]  ;;  %p777_p13 = pneg %p776_p12  ;;  %p783_p2 = por %p782_p1, %p781_p0 }
  0x1f   : > { %364 = vperm.xlu0 %769, %v350_v1   ;;  %770 = vset.pattern.permute.xlu1 %v838_v3  ;;  %v309_v29 = vld [vmem:[%s980_s9 + $0x48] sm:$0xff]  ;;  %v310_v30 = vld [vmem:[%s980_s9 + $0x50] sm:$0xff]  ;;  %v311_v31 = vld [vmem:[%s980_s9 + $0x58] sm:$0xff] }
  0x20   : > { %393 = vperm.xlu1 %770, %v351_v6   ;;  %v312_v32 = vld [vmem:[%s980_s9 + $0x60] sm:$0xff]  ;;  %v313_v33 = vld [vmem:[%s980_s9 + $0x68] sm:$0xff]  ;;  %v314_v34 = vld [vmem:[%s980_s9 + $0x70] sm:$0xff]  ;;  %p784_p3 = pnand %p783_p2, %p777_p13 }
  0x21   : > { %v315_v35 = vld [vmem:[%s980_s9 + $0x78] sm:$0xff] }
  0x23   : > { %419 = vperm.xlu0 %769, %v409_v7  }
  0x24   : > { %771 = vset.pattern.permute.xlu1 %v839_v5 }
  0x25   : > { %414 = vperm.xlu1 %771, %v408_v8  }
  0x29   : > { %424 = vperm.xlu1 %771, %v410_v9  }
  0x2d   : > { %429 = vperm.xlu1 %771, %v411_v10  }
  0x31   : > { %448 = vperm.xlu1 %771, %v443_v11  }
  0x35   : > { %453 = vperm.xlu1 %771, %v444_v12  }
  0x39   : > { %458 = vperm.xlu1 %771, %v445_v13   ;;  %v440_v13 = vld [vmem:[%s1081_s3] sm:$0xff] }
  0x3d   : > { %563 = vperm.xlu1 %771, %v558_v14   ;;  %v441_v14 = vld [vmem:[%s1081_s3 + $0x8] sm:$0xff] }
  0x41   : > { %568 = vperm.xlu1 %771, %v559_v15   ;;  %316 = vxpose.xlu0.b32.start [1/16] (narrow) %v300_v16, 8  ;;  %v442_v15 = vld [vmem:[%s1081_s3 + $0x10] sm:$0xf] }
  0x45   : > { %573 = vperm.xlu1 %771, %v560_v17   ;;  %317 = vxpose.xlu0.b32.cont [2/16] (narrow) %v301_v18, 8 }
  0x49   : > { %592 = vperm.xlu1 %771, %v589_v19   ;;  %318 = vxpose.xlu0.b32.cont [3/16] (narrow) %v302_v20, 8 }
  0x4d   : > { %319 = vxpose.xlu0.b32.cont [4/16] (narrow) %v303_v21, 8 }
  0x51   : > { %320 = vxpose.xlu0.b32.cont [5/16] (narrow) %v304_v23, 8 }
  0x55   : > { %321 = vxpose.xlu0.b32.cont [6/16] (narrow) %v305_v24, 8 }
  0x59   : > { %322 = vxpose.xlu0.b32.cont [7/16] (narrow) %v306_v26, 8 }
  0x5d   : > { %323 = vxpose.xlu0.b32.cont [8/16] (narrow) %v307_v27, 8 }
  0x61   : > { %324 = vxpose.xlu0.b32.cont [9/16] (narrow) %v308_v28, 8 }
  0x65   : > { %325 = vxpose.xlu0.b32.cont [10/16] (narrow) %v309_v29, 8 }
  0x69   : > { %326 = vxpose.xlu0.b32.cont [11/16] (narrow) %v310_v30, 8 }
  0x6d   : > { %327 = vxpose.xlu0.b32.cont [12/16] (narrow) %v311_v31, 8 }
  0x71   : > { %328 = vxpose.xlu0.b32.cont [13/16] (narrow) %v312_v32, 8 }
  0x75   : > { %329 = vxpose.xlu0.b32.cont [14/16] (narrow) %v313_v33, 8 }
  0x79   : > { %330 = vxpose.xlu0.b32.cont [15/16] (narrow) %v314_v34, 8 }
  0x7d   : > { %331 = vxpose.xlu0.b32.end [16/16] (narrow) %v315_v35, 8 }
  0x91   : > { %v382_v36 = vpop.permute.xlu1 %381  ;;  %v390_v37 = vpop.permute.xlu0 %389 }
  0x95   : > { %v386_v38 = vpop.permute.xlu1 %385 }
  0x96   : > { %v355_v39 = vpop.permute.xlu0 %354 }
  0x9a   : > { %v370_v40 = vpop.permute.xlu1 %369  ;;  %v360_v41 = vpop.permute.xlu0 %359 }
  0x9e   : > { %v365_v44 = vpop.permute.xlu0 %364 }
  0x9f   : > { %v394_v42 = vpop.permute.xlu1 %393 }
  0xa2   : > { %v420_v47 = vpop.permute.xlu0 %419 }
  0xa4   : > { %v415_v46 = vpop.permute.xlu1 %414 }
  0xa8   : > { %v425_v51 = vpop.permute.xlu1 %424 }
  0xac   : > { %v430_v2 = vpop.permute.xlu1 %429 }
  0xb0   : > { %v449_v16 = vpop.permute.xlu1 %448 }
  0xb4   : > { %v454_v17 = vpop.permute.xlu1 %453 }
  0xb8   : > { %v459_v18 = vpop.permute.xlu1 %458 }
  0xbc   : > { %v564_v19 = vpop.permute.xlu1 %563 }
  0xc0   : > { %v569_v27 = vpop.permute.xlu1 %568 }
  0xc1   : > { %v332_v50 = vpop.trf.xlu0 }
  0xc2   : > { %v375_v52 = vrot.slane %v332_v50, %v374_v48  ;;  %v399_v53 = vrot.slane %v332_v50, %v398_v49 }
  0xc4   : > { %v378_v54 = vmul.f32 %v375_v52, %v365_v44  ;;  %v379_v55 = vmul.f32 %v375_v52, %v370_v40  ;;  %v402_v56 = vmul.f32 %v399_v53, %v390_v37  ;;  %v403_v57 = vmul.f32 %v399_v53, %v394_v42 }
  0xc5   : > { %v376_v58 = vmul.f32 %v375_v52, %v355_v39  ;;  %v377_v59 = vmul.f32 %v375_v52, %v360_v41  ;;  %v400_v60 = vmul.f32 %v399_v53, %v382_v36  ;;  %v401_v61 = vmul.f32 %v399_v53, %v386_v38  ;;  %v574_v36 = vpop.permute.xlu1 %573 }
  0xc6   : > { %v406_v62 = vadd.f32 %v402_v56, %v378_v54  ;;  %v407_v63 = vadd.f32 %v403_v57, %v379_v55 }
  0xc7   : > { %v404_v0 = vadd.f32 %v400_v60, %v376_v58  ;;  %v405_v1 = vadd.f32 %v401_v61, %v377_v59 }
  0xc8   : > { %v434_v5 = vadd.f32 %v425_v51, %v406_v62  ;;  %v435_v6 = vadd.f32 %v430_v2, %v407_v63 }
  0xc9   : > { %v432_v3 = vadd.f32 %v415_v46, %v404_v0  ;;  %v433_v4 = vadd.f32 %v420_v47, %v405_v1  ;;  %v593_v44 = vpop.permute.xlu1 %592 }
  0xca   : > { %v438_v10 = vmax.f32 %v434_v5, 0.0  ;;  %v439_v11 = vmax.f32 %v435_v6, 0.0  ;;  %v598_v47 = vrot.slane %v593_v44, %v374_v48 }
  0xcb   : > { %v436_v7 = vmax.f32 %v432_v3, 0.0  ;;  %v437_v8 = vmax.f32 %v433_v4, 0.0 }
  0xcc   : > { %v714_v12 = vpack.c.bf16 %v439_v11, %v438_v10 }
  0xcd   : > { %v711_v9 = vpack.c.bf16 %v437_v8, %v436_v7 }
  0xcf   : > { %712 = vmatpush3.bf16.msra.mxu0 %v711_v9  ;;  %719 = vmatpush3.bf16.msra.mxu1 %v711_v9 }
  0xd0   : > { %713 = vmatprep.subr.bf16.mxu0 %v840_v22  ;;  %718 = vmatprep.subr.bf16.mxu1 %v840_v22 }
  0xd3   : > { %716 = vmatpush3.bf16.msk.msra.mxu0 %vm715_vm3, %v714_v12  ;;  %720 = vmatpush3.bf16.msk.msra.mxu1 %vm715_vm3, %v714_v12 }
  0xd6   : > { %702 = vmatmul.mubr.msk.f32.vlgmr.msra.gmra.mrb[0].mxu0 %vm461_vm4, %v440_v13  ;;  %705 = vmatmul.mubr.msk.f32.vlgmr.msra.gmra.mrb[0].mxu1 %vm461_vm4, %v441_v14 }
  0xd7   : > { %707 = vmatprep.mubr.msk.f32.mxu1 %vm841_vm0, %v842_v25 }
  0xda   : > { %708 = vmatmul.mubr.msk.f32.gmra.mrb[2].mxu1 %vm461_vm4, %v442_v15 }
 0x1a9   : > { %v541_v20 = vpop.f32.mrb[0].mxu0  ;;  %v546_v21 = vpop.f32.mrb[0].mxu1 }
 0x1aa   : > { %v542_v22 = vadd.f32 %v541_v20, %v449_v16  ;;  %v547_v23 = vadd.f32 %v546_v21, %v454_v17  ;;  %v706_v24 = vpop.f32.mrb[1].mxu1  ;;  %v703_v26 = vpop.f32.mrb[1].mxu0 }
 0x1ac   : > { %v555_v28 = vmax.f32 %v542_v22, 0.0  ;;  %v556_v29 = vmax.f32 %v547_v23, 0.0 }
 0x1ad   : > { %v551_v30 = vpop.f32.mrb[2].mxu1 }
 0x1ae   : > { %v576_v25 = vmul.f32 %v564_v19, %v555_v28  ;;  %v577_v31 = vmul.f32 %v569_v27, %v556_v29  ;;  %v552_v32 = vadd.f32 %v551_v30, %v459_v18  ;;  %v709_v33 = vpop.f32.mrb[3].mxu1 }
 0x1b0   : > { %v579_v34 = vadd.f32 %v577_v31, %v576_v25  ;;  %v557_v35 = vmax.f32 %v552_v32, 0.0 }
 0x1b2   : > { %v578_v37 = vmul.f32 %v574_v36, %v557_v35 }
 0x1b4   : > { %v581_v38 = vsel %vm580_vm5, %v578_v37, 0.0 }
 0x1b5   : > { %v582_v39 = vadd.f32 %v581_v38, %v579_v34 }
 0x1b7   : > { %v583_v40 = vrot.slane %v582_v39, 4 }
 0x1b9   : > { %v584_v41 = vadd.f32 %v583_v40, %v582_v39 }
 0x1bb   : > { %v585_v42 = vrot.slane %v584_v41, 2 }
 0x1bd   : > { %v586_v43 = vadd.f32 %v585_v42, %v584_v41 }
 0x1bf   : > { %v587_v46 = vrot.slane %v586_v43, 1 }
 0x1c1   : > { %v588_v49 = vadd.f32 %v587_v46, %v586_v43 }
 0x1c3   : > { %v599_v50 = vadd.f32 %v598_v47, %v588_v49 }
 0x1c5   : > { %v600_v51 = vmul.f32 0.5, %v599_v50 }
 0x1c7   : > { %772 = vtanh.f32 %v600_v51 }
 0x1d1   : > { %v773_v52 = vpop.eup %772 }
 0x1d2   : > { %v602_v53 = vadd.f32 1.0, %v773_v52 }
 0x1d4   : > { %v603_v54 = vmul.f32 0.5, %v602_v53 }
 0x1d6   : > { %604 = vst [vmem:[%s285_s24] sm:$0x1] %v603_v54 }
 0x1d7   : > { %787 = shalt.err (!%p784_p3)
}
 0x1d8   : > { %s788_s15 = scalar_lea.hbm %s1036_s10, 16  ;;  %s792_s22 = scalar_lea.hbm %s1085_s7, 32 }
 0x1d9   : > { %p789_p4 = scmp.ne.s32.totalorder %s1036_s10, %s788_s15  ;;  %p793_p9 = scmp.lt.u32.totalorder %s1036_s10, %s1085_s7 }
 0x1da   : > { %p794_p10 = scmp.lt.u32.totalorder %s792_s22, %s788_s15  ;;  %p796_p12 = scmp.lt.u32.totalorder %s788_s15, %s1036_s10 }
 0x1db   : > { %p790_p7 = pnand %p789_p4, %p925_p5 }
 0x1dc   : > { %p795_p11 = por %p794_p10, %p793_p9 }
 0x1dd   : > { %p791_p8 = pneg %p790_p7 }
 0x1de   : > { %p797_p13 = por %p796_p12, %p795_p11 }
 0x1e0   : > { %p798_p0 = pnand %p797_p13, %p791_p8 }
 0x1e2   : > { %801 = shalt.err (!%p798_p0)
}
 0x1e3   : > { %721 = dma.vmem_to_hbm [thread:$0]  (%p925_p5), %s1038_s25, 16, %s1036_s10, %s606_s14  }
 0x1e4 PF: > { %p727_p1 = scmp.ge.s32.totalorder %s836_s29, 2  ;;  %s630_s24 = sand.u32 1, %s824_s26  }
 0x1e5   : > { %s631_s30 = scalar_lea.sflag [#allocation4], %s630_s24 }
 0x1e6   : > { %p724_p2 = pnand %p727_p1, %p929_p6 }
 0x1e8   : > { %819 = dma.done.wait (!%p724_p2), %s631_s30, 16  }
 0x1e9   : > { %821 = vsyncadd (!%p724_p2), %s631_s30, 4294967280  ;;  %p19_p3 = scmp.ge.s32.totalorder %s911_s8, 4   ;;  %s1088_s26 = smov %s828_s27 }
 0x1ea   : > { %s1089_s27 = smov %s832_s28  ;;  %s1090_s28 = smov %s923_s11 }
 0x1eb   : > { %s1091_s29 = smov %s911_s8  ;;  %21 = sbr.rel (!%p19_p3) target bundleno = 6 (0x6), region = 83 }
 0x1f2   :  { %635 = vsyncpa [#allocation4], 1 }
 0x1f3   :  { %637 = vsyncpa [#allocation4 + $0x1], 1 }

</bundles_post_ra>
